<compile_context>
chip_gen: v7x
topology: tpu7x:2x2x1
jax: 0.10.0
libtpu: 0.0.40
codegen_flags: <defaults>
</compile_context>

<pallas_src>
import functools

import jax
import jax.numpy as jnp
from jax import lax
from jax.experimental import pallas as pl
from jax.experimental.pallas import tpu as pltpu

ALPHA = (1.0, 0.25)   # matches default alpha=[1, 0.25]
GAMMA = 2

_LANES = 128
_SUBLANES = 8


def _focal_loss_kernel(x_ref, t_ref, out_ref, acc_ref, *, alpha0, alpha1, gamma):
    i = pl.program_id(1)

    @pl.when(i == 0)
    def _():
        acc_ref[...] = jnp.zeros_like(acc_ref)

    x = x_ref[...].astype(jnp.float32)
    t = t_ref[...].astype(jnp.float32)

    # Numerically-stable BCE-with-logits for hard {0,1} targets, single exp:
    #   z   = x if t==1 else -x          (z = (2t-1)*x)
    #   e   = exp(-|z|)                  (== exp(-|x|))
    #   bce = relu(-z) + log1p(e)        (== max(x,0) - x*t + log1p(exp(-|x|)))
    #   pt  = exp(-bce) = where(z >= 0, 1, e) / (1 + e)   (no second exp)
    z = (2.0 * t - 1.0) * x
    e = jnp.exp(-jnp.abs(z))
    bce = jnp.maximum(-z, 0.0) + jnp.log1p(e)
    pt = jnp.where(z >= 0.0, 1.0, e) / (1.0 + e)

    # alpha.gather(0, targets.long()) for the 2-entry alpha table.
    at = jnp.where(t.astype(jnp.int32) == 1,
                   jnp.float32(alpha1), jnp.float32(alpha0))

    omp = 1.0 - pt
    if gamma == 2:
        omp_pow = omp * omp                          # keep it a multiply
    elif float(gamma) == int(gamma):
        omp_pow = lax.integer_pow(omp, int(gamma))
    else:
        # TODO(synk): non-integer gamma lowers to exp(log(.)) on the EUP.
        omp_pow = omp ** jnp.float32(gamma)

    focal = at * omp_pow * bce                       # (tr, 128)

    # Rows-only partial reduce into a lane-wide accumulator: pure VPU adds,
    # no cross-lane XLU work and no masked (1,1) stores in the hot loop.
    tr = focal.shape[0]
    acc_ref[...] += focal.reshape(tr // _SUBLANES, _SUBLANES, _LANES).sum(axis=0)

    @pl.when(i == pl.num_programs(1) - 1)
    def _():
        out_ref[...] = acc_ref[...].reshape(1, _SUBLANES, _LANES)


def _reference(inputs, targets, alpha=ALPHA, gamma=GAMMA):
    x = inputs.astype(jnp.float32).reshape(-1)
    t = targets.astype(jnp.float32).reshape(-1)
    bce = jnp.maximum(x, 0.0) - x * t + jnp.log1p(jnp.exp(-jnp.abs(x)))
    at = jnp.where(t.astype(jnp.int32) == 1, alpha[1], alpha[0])
    pt = jnp.exp(-bce)
    return jnp.mean(at * (1.0 - pt) ** gamma * bce)


def weighted_focal_loss(inputs, targets, *, alpha=ALPHA, gamma=GAMMA,
                        tile_rows=1024, num_cores=2,
                        min_pallas_elements=1 << 16):
    """Binary focal loss (mean). inputs: logits, targets: {0,1} labels.

    Any layout is flattened; narrower dtypes (bf16 logits, int8/bool targets)
    are accepted and cast to f32 inside the kernel.
    """
    assert inputs.shape == targets.shape
    x = inputs.reshape(-1)
    t = targets.reshape(-1)
    n = x.shape[0]

    # Tiny problems: pallas_call launch/priming overhead outweighs the work.
    if n < min_pallas_elements:
        return _reference(x, t, alpha=alpha, gamma=gamma)

    rows = pl.cdiv(n, _LANES)
    # Big tiles (HBM-bound kernel), clamped for small inputs; multiple of 8.
    tr = min(tile_rows, max(_SUBLANES, pl.cdiv(rows, num_cores)))
    tr = max(_SUBLANES, (tr // _SUBLANES) * _SUBLANES)
    inner = pl.cdiv(rows, num_cores * tr)
    padded_rows = num_cores * tr * inner
    padded_n = padded_rows * _LANES

    pad = padded_n - n
    if pad:
        # (logit = -1e4, target = 0) contributes exactly 0 to the focal sum.
        x = jnp.concatenate([x, jnp.full((pad,), -1e4, dtype=x.dtype)])
        t = jnp.concatenate([t, jnp.zeros((pad,), dtype=t.dtype)])

    x2 = x.reshape(padded_rows, _LANES)
    t2 = t.reshape(padded_rows, _LANES)

    kernel = functools.partial(
        _focal_loss_kernel,
        alpha0=float(alpha[0]), alpha1=float(alpha[1]), gamma=gamma)

    row_block = lambda c, i: (c * inner + i, 0)

    partials = pl.pallas_call(
        kernel,
        out_shape=jax.ShapeDtypeStruct((num_cores, _SUBLANES, _LANES),
                                       jnp.float32),
        grid_spec=pltpu.PrefetchScalarGridSpec(
            num_scalar_prefetch=0,
            grid=(num_cores, inner),
            in_specs=[
                pl.BlockSpec((tr, _LANES), row_block),
                pl.BlockSpec((tr, _LANES), row_block),
            ],
            out_specs=pl.BlockSpec((1, _SUBLANES, _LANES),
                                   lambda c, i: (c, 0, 0)),
            scratch_shapes=[pltpu.VMEM((_SUBLANES, _LANES), jnp.float32)],
        ),
        compiler_params=pltpu.CompilerParams(
            dimension_semantics=("parallel", "arbitrary"),
        ),
    )(x2, t2)

    # Single cheap cross-lane reduce outside the hot loop (also better
    # summation accuracy than a running scalar).
    return jnp.sum(partials) / jnp.float32(n)


if __name__ == "__main__":
    key = jax.random.PRNGKey(0)
    k1, k2, k3, k4 = jax.random.split(key, 4)

    # Small 1-D batch of binary logits / {0,1} labels (the layout the PyTorch
    # forward implies).
    N = 2048
    inputs = jax.random.normal(k1, (N,), dtype=jnp.float32)
    targets = jax.random.bernoulli(k2, p=0.5, shape=(N,)).astype(jnp.float32)

    # Force the Pallas path (the wrapper would otherwise route tiny N to XLA).
    loss = weighted_focal_loss(inputs, targets, min_pallas_elements=0)
    loss = jax.block_until_ready(loss)
    ref = _reference(inputs, targets)
    assert jnp.allclose(loss, ref, rtol=1e-5, atol=1e-6), (loss, ref)

    # A ragged size (not a multiple of 128) exercises padding, multi-step
    # pipelining and the 2-way parallel grid axis.
    N2 = 40_000
    inputs2 = jax.random.normal(k3, (N2,), dtype=jnp.float32)
    targets2 = jax.random.bernoulli(k4, p=0.3, shape=(N2,)).astype(jnp.float32)
    loss2 = weighted_focal_loss(inputs2, targets2, min_pallas_elements=0)
    loss2 = jax.block_until_ready(loss2)
    ref2 = _reference(inputs2, targets2)
    assert jnp.allclose(loss2, ref2, rtol=1e-5, atol=1e-6), (loss2, ref2)

    print("KERNEL_OK")
</pallas_src>

<mosaic_0001>
module attributes {stable_mosaic.version = 11 : i64} {
  func.func @_focal_loss_kernel(%arg0: i32, %arg1: i32, %arg2: memref<8x128xf32, #tpu.memory_space<vmem>>, %arg3: memref<8x128xf32, #tpu.memory_space<vmem>>, %arg4: memref<1x8x128xf32, #tpu.memory_space<vmem>>, %arg5: memref<8x128xf32, #tpu.memory_space<vmem>>) attributes {dimension_semantics = [#tpu.dimension_semantics<parallel>, #tpu.dimension_semantics<arbitrary>], iteration_bounds = array<i64: 2, 1>, scalar_prefetch = 0 : i64, scratch_operands = 1 : i64, tpu.core_type = #tpu.core_type<tc>, window_params = [{transform_indices = @transform_0, window_bounds = array<i64: 8, 128>}, {transform_indices = @transform_1, window_bounds = array<i64: 8, 128>}, {transform_indices = @transform_2, window_bounds = array<i64: 1, 8, 128>}]} {
    %c0_i32 = arith.constant 0 : i32
    %0 = arith.cmpi eq, %arg1, %c0_i32 : i32
    %1 = arith.extui %0 : i1 to i32
    %c0_i32_0 = arith.constant 0 : i32
    %2 = arith.cmpi ne, %1, %c0_i32_0 : i32
    scf.if %2 {
      %cst_21 = arith.constant 0.000000e+00 : f32
      %46 = vector.broadcast %cst_21 : f32 to vector<8x128xf32>
      %c0_22 = arith.constant 0 : index
      %c0_23 = arith.constant 0 : index
      %47 = vector.load %arg5[%c0_22, %c0_23] : memref<8x128xf32, #tpu.memory_space<vmem>>, vector<8x128xf32>
      tpu.vector_store %arg5[%c0_22, %c0_23], %46 {strides = array<i32>} : memref<8x128xf32, #tpu.memory_space<vmem>>, vector<8x128xf32>,
    } else {
    }
    %c0 = arith.constant 0 : index
    %c0_1 = arith.constant 0 : index
    %3 = vector.load %arg2[%c0, %c0_1] : memref<8x128xf32, #tpu.memory_space<vmem>>, vector<8x128xf32>
    %c0_2 = arith.constant 0 : index
    %c0_3 = arith.constant 0 : index
    %4 = vector.load %arg3[%c0_2, %c0_3] : memref<8x128xf32, #tpu.memory_space<vmem>>, vector<8x128xf32>
    %cst = arith.constant 2.000000e+00 : f32
    %5 = vector.broadcast %cst : f32 to vector<8x128xf32>
    %6 = arith.mulf %5, %4 : vector<8x128xf32>
    %cst_4 = arith.constant 1.000000e+00 : f32
    %7 = vector.broadcast %cst_4 : f32 to vector<8x128xf32>
    %8 = arith.subf %6, %7 : vector<8x128xf32>
    %9 = arith.mulf %8, %3 : vector<8x128xf32>
    %10 = math.absf %9 : vector<8x128xf32>
    %cst_5 = arith.constant 0.000000e+00 : f32
    %11 = vector.broadcast %cst_5 : f32 to vector<8x128xf32>
    %12 = arith.subf %11, %10 : vector<8x128xf32>
    %13 = math.exp %12 : vector<8x128xf32>
    %cst_6 = arith.constant 0.000000e+00 : f32
    %14 = vector.broadcast %cst_6 : f32 to vector<8x128xf32>
    %15 = arith.subf %14, %9 : vector<8x128xf32>
    %cst_7 = arith.constant 0.000000e+00 : f32
    %16 = vector.broadcast %cst_7 : f32 to vector<8x128xf32>
    %17 = arith.maximumf %15, %16 : vector<8x128xf32>
    %18 = math.log1p %13 : vector<8x128xf32>
    %19 = arith.addf %17, %18 : vector<8x128xf32>
    %cst_8 = arith.constant 0.000000e+00 : f32
    %20 = vector.broadcast %cst_8 : f32 to vector<8x128xf32>
    %21 = arith.cmpf oge, %9, %20 : vector<8x128xf32>
    %cst_9 = arith.constant 1.000000e+00 : f32
    %22 = vector.broadcast %cst_9 : f32 to vector<8x128xf32>
    %23 = arith.select %21, %22, %13 : vector<8x128xi1>, vector<8x128xf32>
    %cst_10 = arith.constant 1.000000e+00 : f32
    %24 = vector.broadcast %cst_10 : f32 to vector<8x128xf32>
    %25 = arith.addf %24, %13 : vector<8x128xf32>
    %26 = arith.divf %23, %25 : vector<8x128xf32>
    %27 = arith.fptosi %4 : vector<8x128xf32> to vector<8x128xi32>
    %c1_i32 = arith.constant 1 : i32
    %28 = vector.broadcast %c1_i32 : i32 to vector<8x128xi32>
    %29 = arith.cmpi eq, %27, %28 : vector<8x128xi32>
    %cst_11 = arith.constant 2.500000e-01 : f32
    %cst_12 = arith.constant 1.000000e+00 : f32
    %30 = vector.broadcast %cst_11 : f32 to vector<8x128xf32>
    %31 = vector.broadcast %cst_12 : f32 to vector<8x128xf32>
    %32 = arith.select %29, %30, %31 : vector<8x128xi1>, vector<8x128xf32>
    %cst_13 = arith.constant 1.000000e+00 : f32
    %33 = vector.broadcast %cst_13 : f32 to vector<8x128xf32>
    %34 = arith.subf %33, %26 : vector<8x128xf32>
    %35 = arith.mulf %34, %34 : vector<8x128xf32>
    %36 = arith.mulf %32, %35 : vector<8x128xf32>
    %37 = arith.mulf %36, %19 : vector<8x128xf32>
    %c0_14 = arith.constant 0 : index
    %c0_15 = arith.constant 0 : index
    %38 = vector.load %arg5[%c0_14, %c0_15] : memref<8x128xf32, #tpu.memory_space<vmem>>, vector<8x128xf32>
    %39 = vector.shape_cast %37 : vector<8x128xf32> to vector<1x8x128xf32>
    %cst_16 = arith.constant dense<0.000000e+00> : vector<8x128xf32>
    %40 = vector.multi_reduction <add>, %39, %cst_16 [0] : vector<1x8x128xf32> to vector<8x128xf32>
    %41 = arith.addf %38, %40 : vector<8x128xf32>
    %c0_17 = arith.constant 0 : index
    %c0_18 = arith.constant 0 : index
    %42 = vector.load %arg5[%c0_17, %c0_18] : memref<8x128xf32, #tpu.memory_space<vmem>>, vector<8x128xf32>
    tpu.vector_store %arg5[%c0_17, %c0_18], %41 {strides = array<i32>} : memref<8x128xf32, #tpu.memory_space<vmem>>, vector<8x128xf32>,
    %c0_i32_19 = arith.constant 0 : i32
    %43 = arith.cmpi eq, %arg1, %c0_i32_19 : i32
    %44 = arith.extui %43 : i1 to i32
    %c0_i32_20 = arith.constant 0 : i32
    %45 = arith.cmpi ne, %44, %c0_i32_20 : i32
    scf.if %45 {
      %c0_21 = arith.constant 0 : index
      %c0_22 = arith.constant 0 : index
      %46 = vector.load %arg5[%c0_21, %c0_22] : memref<8x128xf32, #tpu.memory_space<vmem>>, vector<8x128xf32>
      %47 = vector.shape_cast %46 : vector<8x128xf32> to vector<1x8x128xf32>
      %c0_23 = arith.constant 0 : index
      %c0_24 = arith.constant 0 : index
      %c0_25 = arith.constant 0 : index
      %48 = vector.load %arg4[%c0_23, %c0_24, %c0_25] : memref<1x8x128xf32, #tpu.memory_space<vmem>>, vector<1x8x128xf32>
      tpu.vector_store %arg4[%c0_23, %c0_24, %c0_25], %47 {strides = array<i32>} : memref<1x8x128xf32, #tpu.memory_space<vmem>>, vector<1x8x128xf32>,
    } else {
    }
    return
  }
  func.func @transform_0(%arg0: i32, %arg1: i32) -> (i32, i32) {
    %c1_i32 = arith.constant 1 : i32
    %0 = arith.muli %arg0, %c1_i32 : i32
    %1 = arith.addi %0, %arg1 : i32
    %c0_i32 = arith.constant 0 : i32
    %c0_i32_0 = arith.constant 0 : i32
    return %1, %c0_i32 : i32, i32
  }
  func.func @transform_1(%arg0: i32, %arg1: i32) -> (i32, i32) {
    %c1_i32 = arith.constant 1 : i32
    %0 = arith.muli %arg0, %c1_i32 : i32
    %1 = arith.addi %0, %arg1 : i32
    %c0_i32 = arith.constant 0 : i32
    %c0_i32_0 = arith.constant 0 : i32
    return %1, %c0_i32 : i32, i32
  }
  func.func @transform_2(%arg0: i32, %arg1: i32) -> (i32, i32, i32) {
    %c0_i32 = arith.constant 0 : i32
    %c0_i32_0 = arith.constant 0 : i32
    %c0_i32_1 = arith.constant 0 : i32
    return %arg0, %c0_i32, %c0_i32_0 : i32, i32, i32
  }
}

</mosaic_0001>

<bundles_post_ra>
// kernel: tpu_custom_call.1
= control target key start
LH: loop header
LB: loop body
LE: loop exit
PB: predicated region body
PF: predicated region fallthrough
CT: control target
= control target key end

     0   :  { %7 = vsyncpa [#allocation4], 0  ;;  %s865_s0 = inlined_call_operand.hbm [shape: f32[16,128], index: 0, kind: input, shape index: {}]   ;;  %s866_s1 = inlined_call_operand.hbm [shape: f32[16,128], index: 1, kind: input, shape index: {}]   ;;  %s867_s2 = inlined_call_operand.hbm [shape: f32[2,8,128], index: 2, kind: output, shape index: {}]  }
   0x1   :  { %9 = vsyncpa [#allocation4 + $0x1], 0 }
   0x2   :  { %10 = vsyncpa [#allocation7], 0 }
   0x3   :  { %12 = vsyncpa [#allocation7 + $0x1], 0 }
   0x4   :  { %13 = vsyncpa [#allocation5], 0 }
   0x5   :  { %15 = vsyncpa [#allocation5 + $0x1], 0  ;;  %s640_s9 = smov 0   ;;  %s642_s10 = smov 0  }
   0x6   :  { %s644_s11 = smov 0   ;;  %s646_s12 = smov 0  }
   0x7   :  { %s648_s13 = smov 0   ;;  %s650_s14 = smov 0  }
   0x8 LB: > { %s380_s15 = sadd.s32 4294967295, %s619_s14   ;;  %s381_s16 = sadd.s32 4294967294, %s619_s14   ;;  %s619_s14 = sphi %s650_s14, %s21_s14   ;;  %s615_s13 = sphi %s648_s13, %s887_s13   ;;  %s611_s12 = sphi %s646_s12, %s886_s12   ;;  %s607_s11 = sphi %s644_s11, %s885_s11   ;;  %s603_s10 = sphi %s642_s10, %s884_s10   ;;  %s599_s9 = sphi %s640_s9, %s883_s9  }
   0x9   : > { %s33_s17 = sadd.s32 1, %s615_s13  ;;  %s42_s18 = sadd.s32 1, %s607_s11 }
   0xa   : > { %p35_p0 = scmp.ge.s32.totalorder %s33_s17, 2  ;;  %p49_p1 = scmp.ne.s32.totalorder %s607_s11, %s603_s10 }
   0xb   : > { %p50_p2 = scmp.eq.s32.totalorder %s619_s14, 0  ;;  %p55_p3 = scmp.ne.s32.totalorder %s603_s10, %s599_s9 }
   0xc   : > { %s889_s17 = smov (%p35_p0, %s33_s17), 0  ;;  %p56_p5 = scmp.eq.s32.totalorder %s380_s15, 0 }
   0xd   : > { %p681_p4 = por %p50_p2, %p49_p1  ;;  %s39_s20 = ssub.s32 %s615_s13, %s889_s17 }
   0xe   : > { %p107_p6 = scmp.eq.s32.totalorder %s380_s15, 1  ;;  %p40_p7 = scmp.eq.s32.totalorder %s39_s20, 0 }
   0xf   : > { %p687_p8 = por %p56_p5, %p55_p3  ;;  %p113_p10 = scmp.eq.s32.totalorder %s381_s16, 1 }
  0x10   : > { %p691_p9 = por %p107_p6, %p49_p1  ;;  %p416_p13 = scmp.lt.s32.totalorder %s619_s14, 2 }
  0x11   : > { %s871_s21 = scalar_select %p687_p8, 1, 0 }
  0x12   : > { %s872_s22 = scalar_select %p691_p9, 1, 0 }
  0x13   : > { %s696_s23 = scalar_select %p40_p7, %s607_s11, %s42_s18  }
  0x14   : > { %p698_p11 = por %p113_p10, %p55_p3  ;;  %s705_s25 = sand.u32 1, %s607_s11  }
  0x15   : > { %s384_s26 = sshll.u32 %s705_s25, 3  ;;  %s385_s27 = sshll.u32 %s615_s13, 7 }
  0x16   : > { %s873_s24 = scalar_select %p698_p11, 1, 0 }
  0x17   : > { %s714_s30 = scalar_lea.hbm %s865_s0, %s385_s27  ;;  %s137_s3 = scalar_lea.vmem [#allocation3], %s384_s26 }
  0x18   : > { %s145_s4 = sshll.u32 %s137_s3, 4  ;;  %p722_p0 = pnand %p416_p13, %p681_p4  ;;  %s718_s4 = int_to_ptr.vmem [resolvable:$true] %s145_s4 }
  0x19   : > { %s134_s6 = scalar_lea.sflag [#allocation4], %s705_s25  ;;  %s473_s7 = scalar_lea.hbm %s714_s30, 128 }
  0x1a   : > { %p474_p3 = scmp.ne.s32.totalorder %s714_s30, %s473_s7  ;;  %p475_p5 = pneg %p722_p0 }
  0x1b   : > { %s478_s16 = scalar_lea.hbm %s865_s0, 256  ;;  %p479_p4 = scmp.lt.u32.totalorder %s714_s30, %s865_s0 }
  0x1c   : > { %p476_p6 = pnand %p475_p5, %p474_p3  ;;  %p480_p10 = scmp.lt.u32.totalorder %s478_s16, %s473_s7 }
  0x1d   : > { %p482_p12 = scmp.lt.u32.totalorder %s473_s7, %s714_s30 }
  0x1e   : > { %p477_p7 = pneg %p476_p6  ;;  %p481_p13 = por %p480_p10, %p479_p4 }
  0x20   : > { %p483_p1 = por %p482_p12, %p481_p13 }
  0x22   : > { %p484_p2 = pnand %p483_p1, %p477_p7 }
  0x24   : > { %487 = shalt.err (!%p484_p2)
}
  0x25   : > { %s488_s20 = scalar_lea.vmem %s718_s4, 128  ;;  %s621_s28 = smov [#allocation3]  }
  0x26   : > { %p489_p3 = scmp.ne.s32.totalorder %s718_s4, %s488_s20  ;;  %s493_s29 = sshll.u32 %s621_s28, 4  ;;  %s494_s29 = int_to_ptr.vmem [resolvable:$false] %s493_s29 }
  0x27   : > { %s495_s3 = scalar_lea.vmem %s494_s29, 256  ;;  %p496_p9 = scmp.lt.s32.totalorder %s718_s4, %s494_s29 }
  0x28   : > { %p491_p6 = pnand %p489_p3, %p475_p5  ;;  %p497_p4 = scmp.lt.s32.totalorder %s495_s3, %s488_s20 }
  0x2a   : > { %p492_p11 = pneg %p491_p6  ;;  %p498_p10 = por %p497_p4, %p496_p9 }
  0x2c   : > { %p499_p12 = pnand %p498_p10, %p492_p11 }
  0x2e   : > { %502 = shalt.err (!%p499_p12)
}
  0x2f   : > { %408 = dma.hbm_to_vmem [thread:$0]  (!%p722_p0), %s714_s30, 128, %s718_s4, %s134_s6  }
  0x30   : > { %p875_p1 = scmp.lt.s32.totalorder %s619_s14, 3  ;;  %p876_p2 = scmp.ge.s32.totalorder %s619_s14, 1 }
  0x31   : > { %s767_s16 = scalar_lea.hbm %s866_s1, %s385_s27  ;;  %s156_s18 = scalar_lea.vmem [#allocation6], %s384_s26 }
  0x32   : > { %p758_p7 = pnand %p876_p2, %p875_p1  ;;  %s164_s19 = sshll.u32 %s156_s18, 4  ;;  %s165_s19 = int_to_ptr.vmem [resolvable:$true] %s164_s19 }
  0x33   : > { %s153_s30 = scalar_lea.sflag [#allocation7], %s705_s25  ;;  %s503_s4 = scalar_lea.hbm %s767_s16, 128 }
  0x34   : > { %s877_s7 = scalar_select %p758_p7, 1, 0 }
  0x35   : > { %p504_p9 = scmp.ne.s32.totalorder %s767_s16, %s503_s4  ;;  %s508_s27 = scalar_lea.hbm %s866_s1, 256 }
  0x36   : > { %p509_p3 = scmp.lt.u32.totalorder %s767_s16, %s866_s1  ;;  %p510_p6 = scmp.lt.u32.totalorder %s508_s27, %s503_s4 }
  0x37   : > { %p506_p11 = pnand %p504_p9, %p475_p5  ;;  %p512_p10 = scmp.lt.u32.totalorder %s503_s4, %s767_s16 }
  0x38   : > { %p511_p4 = por %p510_p6, %p509_p3 }
  0x39   : > { %p507_p13 = pneg %p506_p11 }
  0x3a   : > { %p513_p12 = por %p512_p10, %p511_p4 }
  0x3c   : > { %p514_p1 = pnand %p513_p12, %p507_p13 }
  0x3e   : > { %517 = shalt.err (!%p514_p1)
}
  0x3f   : > { %s518_s25 = scalar_lea.vmem %s165_s19, 128  ;;  %s622_s26 = smov [#allocation6]  }
  0x40   : > { %p519_p2 = scmp.ne.s32.totalorder %s165_s19, %s518_s25  ;;  %s523_s3 = sshll.u32 %s622_s26, 4  ;;  %s524_s3 = int_to_ptr.vmem [resolvable:$false] %s523_s3 }
  0x41   : > { %s525_s8 = scalar_lea.vmem %s524_s3, 256  ;;  %p526_p8 = scmp.lt.s32.totalorder %s165_s19, %s524_s3 }
  0x42   : > { %p521_p9 = pnand %p519_p2, %p475_p5  ;;  %p527_p7 = scmp.lt.s32.totalorder %s525_s8, %s518_s25 }
  0x44   : > { %p522_p11 = pneg %p521_p9  ;;  %p528_p3 = por %p527_p7, %p526_p8 }
  0x46   : > { %p529_p6 = pnand %p528_p3, %p522_p11 }
  0x48   : > { %532 = shalt.err (!%p529_p6)
}
  0x49   : > { %411 = dma.hbm_to_vmem [thread:$0]  (!%p722_p0), %s767_s16, 128, %s165_s19, %s153_s30  }
  0x4a   : > { %p878_p13 = scmp.ne.s32.totalorder %s877_s7, 0 }
  0x4b   : > { %s794_s15 = sand.u32 (!%p878_p13), 1, %s603_s10   ;;  %p879_p8 = scmp.ne.s32.totalorder (!%p878_p13), %s871_s21, 0 }
  0x4c   : > { %173 = sbr.rel (%p878_p13) target bundleno = 148 (0x94), region = 28  ;;  %s797_s18 = sshll.u32 (!%p878_p13), %s794_s15, 3 }
  0x4d   : > { %s176_s4 = scalar_lea.sflag (!%p878_p13), [#allocation4], %s794_s15  ;;  %s179_s6 = scalar_lea.vmem (!%p878_p13), [#allocation3], %s797_s18 }
  0x53   : > { %586 = dma.done.wait (%p879_p8), %s176_s4, 128  }
  0x54   : > { %588 = vsyncadd (%p879_p8), %s176_s4, 4294967168  ;;  %s185_s5 = scalar_lea.sflag [#allocation7], %s794_s15  ;;  %s188_s7 = scalar_lea.vmem [#allocation6], %s797_s18 }
  0x55   : > { %590 = dma.done.wait (%p879_p8), %s185_s5, 128  }
  0x56   : > { %592 = vsyncadd (%p879_p8), %s185_s5, 4294967168  ;;  %v222_v0 = vld [vmem:[%s188_s7] sm:$0xff]  ;;  %v221_v2 = vld [vmem:[%s179_s6] sm:$0xff]  ;;  %v623_v25 = vmov 1.0   ;;  %s213_s21 = scalar_lea.vmem [#allocation8], %s797_s18  ;;  %s394_s19 = sshll.u32 %s611_s12, 7 }
  0x57   : > { %v223_v1 = vmul.f32 2.0, %v222_v0  ;;  %v397_v11 = vtrunc.f32 %v222_v0  ;;  %s277_s16 = sshll.u32 %s213_s21, 4  ;;  %s818_s27 = scalar_lea.hbm %s867_s2, %s394_s19  ;;  %s813_s16 = int_to_ptr.vmem [resolvable:$true] %s277_s16 }
  0x58   : > { %s264_s28 = scalar_lea.sflag [#allocation5], %s794_s15  ;;  %s533_s29 = scalar_lea.vmem %s813_s16, 128 }
  0x59   : > { %v392_v3 = vadd.f32 -1.0, %v223_v1  ;;  %v398_v15 = vcvt.f32.s32 %v397_v11  ;;  %p534_p0 = scmp.ne.s32.totalorder %s813_s16, %s533_s29  ;;  %p880_p5 = scmp.ne.s32.totalorder %s872_s22, 0 }
  0x5a   : > { %s624_s12 = smov [#allocation8]  }
  0x5b   : > { %v225_v4 = vmul.f32 %v392_v3, %v221_v2  ;;  %vm248_vm2 = vcmp.eq.s32.totalorder %v398_v15, 1  ;;  %p535_p7 = pnand %p534_p0, %p880_p5  ;;  %s537_s25 = sshll.u32 %s624_s12, 4  ;;  %s538_s25 = int_to_ptr.vmem [resolvable:$false] %s537_s25 }
  0x5c   : > { %v249_v26 = vsel %vm248_vm2, 0.25, %v623_v25  ;;  %s539_s26 = scalar_lea.vmem %s538_s25, 256  ;;  %p540_p10 = scmp.lt.s32.totalorder %s813_s16, %s538_s25 }
  0x5d   : > { %v226_v5 = vand.u32 2147483647, %v225_v4  ;;  %vm242_vm0 = vcmp.ge.f32.partialorder %v225_v4, 0.0  ;;  %v230_v14 = vsub.f32 0.0, %v225_v4  ;;  %p536_p4 = pneg %p535_p7  ;;  %p541_p12 = scmp.lt.s32.totalorder %s539_s26, %s533_s29 }
  0x5f   : > { %v227_v6 = vsub.f32 0.0, %v226_v5  ;;  %v231_v21 = vmax.f32 %v230_v14, 0.0  ;;  %p542_p1 = por %p541_p12, %p540_p10 }
  0x61   : > { %v228_v7 = vmul.f32 1.442695, %v227_v6  ;;  %p543_p2 = pnand %p542_p1, %p536_p4 }
  0x63   : > { %467 = vpow2.f32 %v228_v7 }
  0x6d   : > { %v468_v8 = vpop.eup %467 }
  0x6e   : > { %v232_v9 = vadd.f32 1.0, %v468_v8  ;;  %v235_v10 = vmul.f32 -0.5, %v468_v8  ;;  %v238_v13 = vand.u32 2147483647, %v468_v8  ;;  %v243_v17 = vsel %vm242_vm0, 1.0, %v468_v8 }
  0x70   : > { %469 = vlog2.f32 %v232_v9  ;;  %v236_v12 = vadd.f32 1.0, %v235_v10  ;;  %vm239_vm1 = vcmp.lt.f32.partialorder %v238_v13, 0.0004427343 }
  0x71   : > { %471 = vrcp.f32 %v232_v9 }
  0x72   : > { %v237_v16 = vmul.f32 %v468_v8, %v236_v12 }
  0x7a   : > { %v470_v18 = vpop.eup %469 }
  0x7b   : > { %v472_v19 = vpop.eup %471  ;;  %v234_v20 = vmul.f32 0.6931472, %v470_v18 }
  0x7c   : > { %v246_v22 = vmul.f32 %v472_v19, %v243_v17 }
  0x7d   : > { %v240_v23 = vsel %vm239_vm1, %v237_v16, %v234_v20 }
  0x7e   : > { %v250_v24 = vsub.f32 1.0, %v246_v22  ;;  %v241_v27 = vadd.f32 %v240_v23, %v231_v21 }
  0x80   : > { %v251_v28 = vmul.f32 %v250_v24, %v250_v24 }
  0x82   : > { %v252_v29 = vmul.f32 %v251_v28, %v249_v26 }
  0x84   : > { %v253_v30 = vmul.f32 %v252_v29, %v241_v27 }
  0x86   : > { %262 = vst [vmem:[%s213_s21] sm:$0xff] %v253_v30 }
  0x87   : > { %546 = shalt.err (!%p543_p2)
}
  0x88   : > { %s547_s3 = scalar_lea.hbm %s818_s27, 128  ;;  %s551_s18 = scalar_lea.hbm %s867_s2, 256 }
  0x89   : > { %p548_p9 = scmp.ne.s32.totalorder %s818_s27, %s547_s3  ;;  %p552_p6 = scmp.lt.u32.totalorder %s818_s27, %s867_s2 }
  0x8a   : > { %p553_p13 = scmp.lt.u32.totalorder %s551_s18, %s547_s3  ;;  %p555_p0 = scmp.lt.u32.totalorder %s547_s3, %s818_s27 }
  0x8b   : > { %p549_p11 = pnand %p548_p9, %p880_p5 }
  0x8c   : > { %p554_p8 = por %p553_p13, %p552_p6 }
  0x8d   : > { %p550_p3 = pneg %p549_p11 }
  0x8e   : > { %p556_p7 = por %p555_p0, %p554_p8 }
  0x90   : > { %p557_p4 = pnand %p556_p7, %p550_p3 }
  0x92   : > { %560 = shalt.err (!%p557_p4)
}
  0x93   : > { %403 = dma.vmem_to_hbm [thread:$0]  (%p880_p5), %s813_s16, 128, %s818_s27, %s264_s28  }
  0x94 PF: > { %s289_s5 = sand.u32 1, %s599_s9   ;;  %p881_p10 = scmp.ne.s32.totalorder %s873_s24, 0 }
  0x95   : > { %p882_p12 = scmp.ge.s32.totalorder %s619_s14, 2  ;;  %s290_s7 = scalar_lea.sflag [#allocation5], %s289_s5 }
  0x97   : > { %p413_p1 = pnand %p882_p12, %p881_p10 }
  0x99   : > { %594 = dma.done.wait (!%p413_p1), %s290_s7, 128  }
  0x9a   : > { %596 = vsyncadd (!%p413_p1), %s290_s7, 4294967168  ;;  %s21_s14 = sadd.s32 1, %s619_s14   ;;  %s883_s9 = smov %s603_s10 }
  0x9b   : > { %p18_p2 = scmp.ge.s32.totalorder %s21_s14, 4   ;;  %s884_s10 = smov %s607_s11 }
  0x9c   : > { %s885_s11 = smov %s696_s23  ;;  %s886_s12 = smov %s615_s13 }
  0x9d   : > { %s887_s13 = smov %s889_s17  ;;  %20 = sbr.rel (!%p18_p2) target bundleno = 8 (0x8), region = 94 }
  0xa4   :  { %295 = vsyncpa [#allocation4], 1 }
  0xa5   :  { %297 = vsyncpa [#allocation4 + $0x1], 1 }
  0xa6   :  { %298 = vsyncpa [#allocation7], 1 }
  0xa7   :  { %300 = vsyncpa [#allocation7 + $0x1], 1 }
  0xa8   :  { %301 = vsyncpa [#allocation5], 1 }
  0xa9   :  { %303 = vsyncpa [#allocation5 + $0x1], 1 }

</bundles_post_ra>
